<compile_context>
chip_gen: v7x
topology: tpu7x:2x2x1
jax: 0.10.0
libtpu: 0.0.40
codegen_flags: <defaults>
</compile_context>

<pallas_src>
import functools

import jax
import jax.numpy as jnp
from jax import lax
from jax.experimental import pallas as pl
from jax.experimental.pallas import tpu as pltpu

_LANES = 128


@functools.lru_cache(maxsize=None)
def _chip_config():
    """Best-effort per-generation tuning.

    Returns (tensorcores_per_chip, max_tile_rows, vmem_limit_bytes, has_bf16_valu).
    Falls back to safe single-core / 4096-row settings if detection fails.
    """
    kind = ""
    try:
        kind = jax.devices()[0].device_kind.lower()
    except Exception:
        pass
    vmem_bytes = None
    try:
        vmem_bytes = int(pltpu.get_tpu_info().vmem_capacity_bytes)
    except Exception:
        vmem_bytes = None

    is_v7 = "v7" in kind
    if vmem_bytes is None:
        vmem_bytes = (64 if is_v7 else 128) * 1024 * 1024

    if is_v7 or vmem_bytes <= 96 * 1024 * 1024:
        # v7x: only 64 MiB VMEM per TensorCore -> conservative tile + limit.
        max_tile_rows = 4096                 # (4096,128) f32 block = 2 MiB
        vmem_limit = 32 * 1024 * 1024
    else:
        # v5e / v6e: 128 MiB VMEM -> bigger blocks shave per-grid-step overhead.
        max_tile_rows = 8192                 # (8192,128) f32 block = 4 MiB
        vmem_limit = 64 * 1024 * 1024

    cores = 2 if is_v7 else 1                # leading split only worth it on v7x
    has_bf16_valu = not ("v5 lite" in kind or "v5e" in kind or "v5lite" in kind)
    return cores, max_tile_rows, vmem_limit, has_bf16_valu


def _dice_kernel(x_ref, t_ref, prod_ref, sum_ref, *, rows, tile_rows, acc_rows,
                 need_mask, upcast_inputs):
    c = pl.program_id(0)          # per-TensorCore split (size 1 on 1-TC chips)
    i = pl.program_id(1)          # reduction ("arbitrary") axis
    steps = pl.num_programs(1)

    @pl.when(i == 0)
    def _init():
        prod_ref[...] = jnp.zeros_like(prod_ref)
        sum_ref[...] = jnp.zeros_like(sum_ref)

    x = x_ref[...]
    t = t_ref[...]
    if upcast_inputs:             # v5e (no bf16 VALU) / non-f32/bf16 dtypes
        x = x.astype(jnp.float32)
        t = t.astype(jnp.float32)
    prod = x * t                  # -> sum(x * t)
    both = x + t                  # -> sum(x) + sum(t) == sum(x + t)

    def _accumulate(p, s):
        # Cast the per-element results to f32, then reduce into (acc_rows, 128)
        # per-lane partials.  With acc_rows == 8 the reshape keeps whole vregs
        # together, so the reduce is a pure VPU vreg-add tree (no per-step
        # cross-sublane XLU work); the tiny final reduce happens in the wrapper.
        p32 = p.astype(jnp.float32)
        s32 = s.astype(jnp.float32)
        if acc_rows == 1:
            pp = jnp.sum(p32, axis=0, keepdims=True)
            ss = jnp.sum(s32, axis=0, keepdims=True)
        else:
            pp = jnp.sum(p32.reshape(tile_rows // acc_rows, acc_rows, _LANES), axis=0)
            ss = jnp.sum(s32.reshape(tile_rows // acc_rows, acc_rows, _LANES), axis=0)
        prod_ref[...] += pp[None]
        sum_ref[...] += ss[None]

    if need_mask:
        logical_block = c * steps + i
        row0 = logical_block * tile_rows
        is_partial = row0 + tile_rows > rows

        @pl.when(is_partial)
        def _masked():
            # (tile_rows, 1) row iota -> cheap broadcast in the selects.
            # jnp.where (not multiply-by-mask) so clipped-edge DMA garbage /
            # NaN and clamped duplicate blocks cannot leak in.
            row_ids = row0 + lax.broadcasted_iota(jnp.int32, (tile_rows, 1), 0)
            valid = row_ids < rows
            _accumulate(jnp.where(valid, prod, jnp.zeros_like(prod)),
                        jnp.where(valid, both, jnp.zeros_like(both)))

        @pl.when(jnp.logical_not(is_partial))
        def _full():
            _accumulate(prod, both)
    else:
        _accumulate(prod, both)


def _dice_from_sums(intersection, total, smooth):
    dice = (2.0 * intersection + smooth) / (total + smooth)
    return (1.0 - dice).astype(jnp.float32)


def dice_loss(inputs, targets, smooth=1.0):
    """Pallas implementation of DiceLoss.forward (returns scalar f32)."""
    cores, max_tile_rows, vmem_limit, has_bf16_valu = _chip_config()

    x = inputs.reshape(-1)
    t = targets.reshape(-1)
    n = x.shape[0]
    rows = n // _LANES
    n_main = rows * _LANES

    # <128-element ragged tail: done in plain JAX on a tiny slice instead of
    # jnp.pad-ing (and re-copying) both full inputs through HBM.
    if n_main != n:
        tx = x[n_main:].astype(jnp.float32)
        tt = t[n_main:].astype(jnp.float32)
        tail_inter = jnp.sum(tx * tt)
        tail_total = jnp.sum(tx) + jnp.sum(tt)
    else:
        tail_inter = jnp.float32(0.0)
        tail_total = jnp.float32(0.0)

    if rows == 0:                      # entire input fits in the tail path
        return _dice_from_sums(tail_inter, tail_total, smooth)

    x2 = (x if n_main == n else x[:n_main]).reshape(rows, _LANES)
    t2 = (t if n_main == n else t[:n_main]).reshape(rows, _LANES)

    tile_rows = rows if rows <= max_tile_rows else max_tile_rows
    grid_len = pl.cdiv(rows, tile_rows)          # total number of row blocks
    acc_rows = 8 if tile_rows % 8 == 0 else 1    # (8,128) accumulators when possible

    compute_dtype = jnp.result_type(x2.dtype, t2.dtype)
    upcast_inputs = not (compute_dtype == jnp.float32 or
                         (compute_dtype == jnp.bfloat16 and has_bf16_valu))

    def _run(num_splits):
        steps = pl.cdiv(grid_len, num_splits)
        # Keep this coupling: the in-kernel row mask relies on it (covers both
        # the ragged last block and the clamped duplicate overflow block of an
        # uneven split).
        need_mask = (num_splits * steps * tile_rows != rows)

        def in_index_map(c, i):
            # Clamp so an overflow block of an uneven split stays in bounds;
            # the kernel masks its contribution to zero.
            return (jnp.minimum(c * steps + i, grid_len - 1), 0)

        def out_index_map(c, i):
            return (c, 0, 0)

        kernel = functools.partial(
            _dice_kernel, rows=rows, tile_rows=tile_rows, acc_rows=acc_rows,
            need_mask=need_mask, upcast_inputs=upcast_inputs)

        # Only CORE_PARALLEL reliably shards a grid axis across v7x TensorCores;
        # plain "parallel"/"arbitrary" is fine (and equivalent) on 1-TC chips.
        dim_sem = ((pltpu.CORE_PARALLEL, pltpu.ARBITRARY) if num_splits > 1
                   else ("arbitrary", "arbitrary"))

        return pl.pallas_call(
            kernel,
            out_shape=(
                jax.ShapeDtypeStruct((num_splits, acc_rows, _LANES), jnp.float32),
                jax.ShapeDtypeStruct((num_splits, acc_rows, _LANES), jnp.float32),
            ),
            grid_spec=pltpu.PrefetchScalarGridSpec(
                num_scalar_prefetch=0,
                grid=(num_splits, steps),
                in_specs=[
                    pl.BlockSpec((tile_rows, _LANES), in_index_map),
                    pl.BlockSpec((tile_rows, _LANES), in_index_map),
                ],
                out_specs=[
                    pl.BlockSpec((1, acc_rows, _LANES), out_index_map),
                    pl.BlockSpec((1, acc_rows, _LANES), out_index_map),
                ],
            ),
            compiler_params=pltpu.CompilerParams(
                dimension_semantics=dim_sem,
                vmem_limit_bytes=vmem_limit,
            ),
        )(x2, t2)

    num_splits = cores if (cores > 1 and grid_len >= cores) else 1
    if num_splits > 1:
        try:
            prod_parts, sum_parts = _run(num_splits)
        except Exception:
            # Defensive fallback if CORE_PARALLEL is rejected on this stack.
            prod_parts, sum_parts = _run(1)
    else:
        prod_parts, sum_parts = _run(1)

    intersection = jnp.sum(prod_parts) + tail_inter
    total = jnp.sum(sum_parts) + tail_total
    return _dice_from_sums(intersection, total, smooth)


def dice_loss_ref(inputs, targets, smooth=1.0):
    x = inputs.reshape(-1).astype(jnp.float32)
    t = targets.reshape(-1).astype(jnp.float32)
    intersection = jnp.sum(x * t)
    dice = (2.0 * intersection + smooth) / (jnp.sum(x) + jnp.sum(t) + smooth)
    return 1.0 - dice


if __name__ == "__main__":
    key = jax.random.PRNGKey(0)
    k1, k2, k3, k4, k5, k6 = jax.random.split(key, 6)

    # Small NCHW case, as a segmentation head would produce.
    inputs = jax.nn.sigmoid(jax.random.normal(k1, (2, 4, 16, 16), jnp.float32))
    targets = (jax.random.uniform(k2, (2, 4, 16, 16)) > 0.5).astype(jnp.float32)
    loss = jax.block_until_ready(dice_loss(inputs, targets, smooth=1.0))
    ref = jax.block_until_ready(dice_loss_ref(inputs, targets, smooth=1.0))
    assert jnp.allclose(loss, ref, atol=1e-5, rtol=1e-5), (loss, ref)

    # bf16 case: native-dtype HBM traffic; bf16 math path on bf16-VALU chips.
    inputs2 = jax.nn.sigmoid(
        jax.random.normal(k3, (2, 4, 300, 300), jnp.float32)).astype(jnp.bfloat16)
    targets2 = (jax.random.uniform(k4, (2, 4, 300, 300)) > 0.5).astype(jnp.bfloat16)
    loss2 = jax.block_until_ready(dice_loss(inputs2, targets2, smooth=1.0))
    ref2 = jax.block_until_ready(dice_loss_ref(inputs2, targets2, smooth=1.0))
    assert jnp.allclose(loss2, ref2, atol=1e-3, rtol=1e-3), (loss2, ref2)

    # Ragged case: multi-block grid, in-kernel masked last block, and a
    # <128-element tail handled in the wrapper (no jnp.pad copy).
    inputs3 = jax.nn.sigmoid(jax.random.normal(k5, (1, 8, 370, 370), jnp.float32))
    targets3 = (jax.random.uniform(k6, (1, 8, 370, 370)) > 0.5).astype(jnp.float32)
    loss3 = jax.block_until_ready(dice_loss(inputs3, targets3, smooth=1.0))
    ref3 = jax.block_until_ready(dice_loss_ref(inputs3, targets3, smooth=1.0))
    assert jnp.allclose(loss3, ref3, atol=1e-4, rtol=1e-4), (loss3, ref3)

    print("KERNEL_OK")
</pallas_src>

<mosaic_0001>
module attributes {stable_mosaic.version = 11 : i64} {
  func.func @_dice_kernel(%arg0: i32, %arg1: i32, %arg2: memref<16x128xf32, #tpu.memory_space<vmem>>, %arg3: memref<16x128xf32, #tpu.memory_space<vmem>>, %arg4: memref<1x8x128xf32, #tpu.memory_space<vmem>>, %arg5: memref<1x8x128xf32, #tpu.memory_space<vmem>>) attributes {dimension_semantics = [#tpu.dimension_semantics<arbitrary>, #tpu.dimension_semantics<arbitrary>], iteration_bounds = array<i64: 1, 1>, scalar_prefetch = 0 : i64, scratch_operands = 0 : i64, tpu.core_type = #tpu.core_type<tc>, window_params = [{transform_indices = @transform_0, window_bounds = array<i64: 16, 128>}, {transform_indices = @transform_1, window_bounds = array<i64: 16, 128>}, {transform_indices = @transform_2, window_bounds = array<i64: 1, 8, 128>}, {transform_indices = @transform_3, window_bounds = array<i64: 1, 8, 128>}]} {
    %c0_i32 = arith.constant 0 : i32
    %0 = arith.cmpi eq, %arg1, %c0_i32 : i32
    %1 = arith.extui %0 : i1 to i32
    %c0_i32_0 = arith.constant 0 : i32
    %2 = arith.cmpi ne, %1, %c0_i32_0 : i32
    scf.if %2 {
      %cst_17 = arith.constant 0.000000e+00 : f32
      %19 = vector.broadcast %cst_17 : f32 to vector<1x8x128xf32>
      %c0_18 = arith.constant 0 : index
      %c0_19 = arith.constant 0 : index
      %c0_20 = arith.constant 0 : index
      %20 = vector.load %arg4[%c0_18, %c0_19, %c0_20] : memref<1x8x128xf32, #tpu.memory_space<vmem>>, vector<1x8x128xf32>
      tpu.vector_store %arg4[%c0_18, %c0_19, %c0_20], %19 {strides = array<i32>} : memref<1x8x128xf32, #tpu.memory_space<vmem>>, vector<1x8x128xf32>,
      %cst_21 = arith.constant 0.000000e+00 : f32
      %21 = vector.broadcast %cst_21 : f32 to vector<1x8x128xf32>
      %c0_22 = arith.constant 0 : index
      %c0_23 = arith.constant 0 : index
      %c0_24 = arith.constant 0 : index
      %22 = vector.load %arg5[%c0_22, %c0_23, %c0_24] : memref<1x8x128xf32, #tpu.memory_space<vmem>>, vector<1x8x128xf32>
      tpu.vector_store %arg5[%c0_22, %c0_23, %c0_24], %21 {strides = array<i32>} : memref<1x8x128xf32, #tpu.memory_space<vmem>>, vector<1x8x128xf32>,
    } else {
    }
    %c0 = arith.constant 0 : index
    %c0_1 = arith.constant 0 : index
    %3 = vector.load %arg2[%c0, %c0_1] : memref<16x128xf32, #tpu.memory_space<vmem>>, vector<16x128xf32>
    %c0_2 = arith.constant 0 : index
    %c0_3 = arith.constant 0 : index
    %4 = vector.load %arg3[%c0_2, %c0_3] : memref<16x128xf32, #tpu.memory_space<vmem>>, vector<16x128xf32>
    %5 = arith.mulf %3, %4 : vector<16x128xf32>
    %6 = arith.addf %3, %4 : vector<16x128xf32>
    %7 = vector.shape_cast %5 : vector<16x128xf32> to vector<2x8x128xf32>
    %cst = arith.constant dense<0.000000e+00> : vector<8x128xf32>
    %8 = vector.multi_reduction <add>, %7, %cst [0] : vector<2x8x128xf32> to vector<8x128xf32>
    %9 = vector.shape_cast %6 : vector<16x128xf32> to vector<2x8x128xf32>
    %cst_4 = arith.constant dense<0.000000e+00> : vector<8x128xf32>
    %10 = vector.multi_reduction <add>, %9, %cst_4 [0] : vector<2x8x128xf32> to vector<8x128xf32>
    %c0_5 = arith.constant 0 : index
    %c0_6 = arith.constant 0 : index
    %c0_7 = arith.constant 0 : index
    %11 = vector.load %arg4[%c0_5, %c0_6, %c0_7] : memref<1x8x128xf32, #tpu.memory_space<vmem>>, vector<1x8x128xf32>
    %12 = vector.shape_cast %8 : vector<8x128xf32> to vector<1x8x128xf32>
    %13 = arith.addf %11, %12 : vector<1x8x128xf32>
    %c0_8 = arith.constant 0 : index
    %c0_9 = arith.constant 0 : index
    %c0_10 = arith.constant 0 : index
    %14 = vector.load %arg4[%c0_8, %c0_9, %c0_10] : memref<1x8x128xf32, #tpu.memory_space<vmem>>, vector<1x8x128xf32>
    tpu.vector_store %arg4[%c0_8, %c0_9, %c0_10], %13 {strides = array<i32>} : memref<1x8x128xf32, #tpu.memory_space<vmem>>, vector<1x8x128xf32>,
    %c0_11 = arith.constant 0 : index
    %c0_12 = arith.constant 0 : index
    %c0_13 = arith.constant 0 : index
    %15 = vector.load %arg5[%c0_11, %c0_12, %c0_13] : memref<1x8x128xf32, #tpu.memory_space<vmem>>, vector<1x8x128xf32>
    %16 = vector.shape_cast %10 : vector<8x128xf32> to vector<1x8x128xf32>
    %17 = arith.addf %15, %16 : vector<1x8x128xf32>
    %c0_14 = arith.constant 0 : index
    %c0_15 = arith.constant 0 : index
    %c0_16 = arith.constant 0 : index
    %18 = vector.load %arg5[%c0_14, %c0_15, %c0_16] : memref<1x8x128xf32, #tpu.memory_space<vmem>>, vector<1x8x128xf32>
    tpu.vector_store %arg5[%c0_14, %c0_15, %c0_16], %17 {strides = array<i32>} : memref<1x8x128xf32, #tpu.memory_space<vmem>>, vector<1x8x128xf32>,
    return
  }
  func.func @transform_0(%arg0: i32, %arg1: i32) -> (i32, i32) {
    %c1_i32 = arith.constant 1 : i32
    %0 = arith.muli %arg0, %c1_i32 : i32
    %1 = arith.addi %0, %arg1 : i32
    %c0_i32 = arith.constant 0 : i32
    %2 = arith.minsi %1, %c0_i32 : i32
    %c0_i32_0 = arith.constant 0 : i32
    %c0_i32_1 = arith.constant 0 : i32
    return %2, %c0_i32_0 : i32, i32
  }
  func.func @transform_1(%arg0: i32, %arg1: i32) -> (i32, i32) {
    %c1_i32 = arith.constant 1 : i32
    %0 = arith.muli %arg0, %c1_i32 : i32
    %1 = arith.addi %0, %arg1 : i32
    %c0_i32 = arith.constant 0 : i32
    %2 = arith.minsi %1, %c0_i32 : i32
    %c0_i32_0 = arith.constant 0 : i32
    %c0_i32_1 = arith.constant 0 : i32
    return %2, %c0_i32_0 : i32, i32
  }
  func.func @transform_2(%arg0: i32, %arg1: i32) -> (i32, i32, i32) {
    %c0_i32 = arith.constant 0 : i32
    %c0_i32_0 = arith.constant 0 : i32
    %c0_i32_1 = arith.constant 0 : i32
    return %arg0, %c0_i32, %c0_i32_0 : i32, i32, i32
  }
  func.func @transform_3(%arg0: i32, %arg1: i32) -> (i32, i32, i32) {
    %c0_i32 = arith.constant 0 : i32
    %c0_i32_0 = arith.constant 0 : i32
    %c0_i32_1 = arith.constant 0 : i32
    return %arg0, %c0_i32, %c0_i32_0 : i32, i32, i32
  }
}

</mosaic_0001>

<bundles_post_ra>
// kernel: tpu_custom_call.1
= control target key start
LH: loop header
LB: loop body
LE: loop exit
PB: predicated region body
PF: predicated region fallthrough
CT: control target
= control target key end

     0   :  { %9 = vsyncpa [#allocation3], 0  ;;  %s296_s0 = inlined_call_operand.hbm [shape: f32[16,128], index: 0, kind: input, shape index: {}]   ;;  %s297_s1 = inlined_call_operand.hbm [shape: f32[16,128], index: 1, kind: input, shape index: {}]   ;;  %s298_s2 = inlined_call_operand.hbm [shape: f32[1,8,128], index: 2, kind: output, shape index: {0}]   ;;  %s299_s3 = inlined_call_operand.hbm [shape: f32[1,8,128], index: 3, kind: output, shape index: {1}]  }
   0x1   :  { %10 = vsyncpa [#allocation6], 0 }
   0x2   :  { %11 = vsyncpa [#allocation4], 0 }
   0x3   :  { %12 = vsyncpa [#allocation9], 0  ;;  %s222_s12 = smov [#allocation2]   ;;  %s126_s16 = scalar_lea.hbm %s296_s0, 256 }
   0x4   :  { %s24_s13 = sshll.u32 %s222_s12, 4  ;;  %p127_p0 = scmp.ne.s32.totalorder %s296_s0, %s126_s16  ;;  %s25_s13 = int_to_ptr.vmem [resolvable:$true] %s24_s13 }
   0x5   :  { %p130_p1 = scmp.lt.u32.totalorder %s126_s16, %s296_s0 }
   0x7   :  { %p132_p2 = pnand %p130_p1, %p127_p0 }
   0x9   :  { %135 = shalt.err (!%p132_p2)
}
   0xa   :  { %s136_s21 = scalar_lea.vmem %s25_s13, 256  ;;  %p141_p4 = scmp.lt.s32.totalorder %s25_s13, %s25_s13 }
   0xb   :  { %p137_p3 = scmp.ne.s32.totalorder %s25_s13, %s136_s21  ;;  %p142_p5 = scmp.lt.s32.totalorder %s136_s21, %s136_s21 }
   0xd   :  { %p143_p6 = por %p142_p5, %p141_p4 }
   0xf   :  { %p144_p7 = pnand %p143_p6, %p137_p3 }
  0x11   :  { %147 = shalt.err (!%p144_p7)
}
  0x12   :  { %s223_s22 = smov 128   ;;  %s224_s23 = smov 8  }
  0x13   :  { %30 = dma.hbm_to_vmem [thread:$0]  %s296_s0, 256, %s25_s13, [#allocation3], %s223_s22, %s223_s22, %s224_s23  }
  0x14   :  { %s225_s26 = smov [#allocation5]   ;;  %s148_s30 = scalar_lea.hbm %s297_s1, 256 }
  0x15   :  { %s42_s27 = sshll.u32 %s225_s26, 4  ;;  %p149_p8 = scmp.ne.s32.totalorder %s297_s1, %s148_s30  ;;  %s43_s27 = int_to_ptr.vmem [resolvable:$true] %s42_s27 }
  0x16   :  { %p152_p9 = scmp.lt.u32.totalorder %s148_s30, %s297_s1 }
  0x18   :  { %p154_p10 = pnand %p152_p9, %p149_p8 }
  0x1a   :  { %157 = shalt.err (!%p154_p10)
}
  0x1b   :  { %s158_s8 = scalar_lea.vmem %s43_s27, 256  ;;  %p163_p12 = scmp.lt.s32.totalorder %s43_s27, %s43_s27 }
  0x1c   :  { %p159_p11 = scmp.ne.s32.totalorder %s43_s27, %s158_s8  ;;  %p164_p13 = scmp.lt.s32.totalorder %s158_s8, %s158_s8 }
  0x1e   :  { %p165_p0 = por %p164_p13, %p163_p12 }
  0x20   :  { %p166_p1 = pnand %p165_p0, %p159_p11 }
  0x22   :  { %169 = shalt.err (!%p166_p1)
}
  0x23   :  { %48 = dma.hbm_to_vmem [thread:$0]  %s297_s1, 256, %s43_s27, [#allocation6], %s223_s22, %s223_s22, %s224_s23  }
  0x24   :  { %214 = dma.done.wait [#allocation3], 256  }
  0x25   :  { %215 = vsyncadd [#allocation3], 4294967040 }
  0x26   :  { %216 = dma.done.wait [#allocation6], 256  }
  0x27   :  { %217 = vsyncadd [#allocation6], 4294967040  ;;  %v69_v0 = vld [vmem:[#allocation2] sm:$0xff]  ;;  %v70_v1 = vld [vmem:[#allocation2 + $0x8] sm:$0xff]  ;;  %s226_s10 = smov [#allocation7]   ;;  %s227_s12 = smov [#allocation8]  }
  0x28   :  { %v71_v2 = vld [vmem:[#allocation5] sm:$0xff]  ;;  %v72_v3 = vld [vmem:[#allocation5 + $0x8] sm:$0xff]  ;;  %s91_s11 = sshll.u32 %s226_s10, 4  ;;  %s101_s13 = sshll.u32 %s227_s12, 4  ;;  %s92_s11 = int_to_ptr.vmem [resolvable:$true] %s91_s11  ;;  %s102_s13 = int_to_ptr.vmem [resolvable:$true] %s101_s13 }
  0x29   :  { %v73_v4 = vmul.f32 %v71_v2, %v69_v0  ;;  %v75_v5 = vadd.f32 %v71_v2, %v69_v0  ;;  %v74_v6 = vmul.f32 %v72_v3, %v70_v1  ;;  %v76_v7 = vadd.f32 %v72_v3, %v70_v1  ;;  %s170_s1 = scalar_lea.vmem %s92_s11, 128  ;;  %p175_p3 = scmp.lt.s32.totalorder %s92_s11, %s92_s11 }
  0x2a   :  { %p171_p2 = scmp.ne.s32.totalorder %s92_s11, %s170_s1  ;;  %p176_p4 = scmp.lt.s32.totalorder %s170_s1, %s170_s1 }
  0x2b   :  { %v77_v8 = vadd.f32 %v74_v6, %v73_v4  ;;  %v78_v9 = vadd.f32 %v76_v7, %v75_v5 }
  0x2c   :  { %p177_p5 = por %p176_p4, %p175_p3 }
  0x2d   :  { %81 = vst [vmem:[#allocation7] sm:$0xff] %v77_v8  ;;  %84 = vst [vmem:[#allocation8] sm:$0xff] %v78_v9 }
  0x2e   :  { %p178_p6 = pnand %p177_p5, %p171_p2 }
  0x30   :  { %181 = shalt.err (!%p178_p6)
}
  0x31   :  { %s182_s16 = scalar_lea.hbm %s298_s2, 128 }
  0x32   :  { %p183_p7 = scmp.ne.s32.totalorder %s298_s2, %s182_s16  ;;  %p186_p8 = scmp.lt.u32.totalorder %s182_s16, %s298_s2 }
  0x34   :  { %p188_p9 = pnand %p186_p8, %p183_p7 }
  0x36   :  { %191 = shalt.err (!%p188_p9)
}
  0x37   :  { %94 = dma.vmem_to_hbm [thread:$0]  %s92_s11, 128, %s298_s2, [#allocation4]  }
  0x38   :  { %s192_s23 = scalar_lea.vmem %s102_s13, 128  ;;  %p197_p11 = scmp.lt.s32.totalorder %s102_s13, %s102_s13 }
  0x39   :  { %p193_p10 = scmp.ne.s32.totalorder %s102_s13, %s192_s23  ;;  %p198_p12 = scmp.lt.s32.totalorder %s192_s23, %s192_s23 }
  0x3b   :  { %p199_p13 = por %p198_p12, %p197_p11 }
  0x3d   :  { %p200_p0 = pnand %p199_p13, %p193_p10 }
  0x3f   :  { %203 = shalt.err (!%p200_p0)
}
  0x40   :  { %s204_s26 = scalar_lea.hbm %s299_s3, 128 }
  0x41   :  { %p205_p1 = scmp.ne.s32.totalorder %s299_s3, %s204_s26  ;;  %p208_p2 = scmp.lt.u32.totalorder %s204_s26, %s299_s3 }
  0x43   :  { %p210_p3 = pnand %p208_p2, %p205_p1 }
  0x45   :  { %213 = shalt.err (!%p210_p3)
}
  0x46   :  { %104 = dma.vmem_to_hbm [thread:$0]  %s102_s13, 128, %s299_s3, [#allocation9]  }
  0x47   :  { %218 = dma.done.wait [#allocation4], 128  }
  0x48   :  { %219 = vsyncadd [#allocation4], 4294967168 }
  0x49   :  { %220 = dma.done.wait [#allocation9], 128  }
  0x4a   :  { %221 = vsyncadd [#allocation9], 4294967168 }
  0x4b   :  { %111 = vsyncpa [#allocation3], 1 }
  0x4c   :  { %112 = vsyncpa [#allocation6], 1 }
  0x4d   :  { %113 = vsyncpa [#allocation4], 1 }
  0x4e   :  { %114 = vsyncpa [#allocation9], 1 }

</bundles_post_ra>
